<compile_context>
chip_gen: v6e
topology: v6e:2x2x1
jax: 0.10.0
libtpu: 0.0.40
codegen_flags: <defaults>
</compile_context>

<pallas_src>
import jax
import jax.numpy as jnp
from jax.experimental import pallas as pl
from jax.experimental.pallas import tpu as pltpu


def _embedding_kernel(idx_ref, table_ref, out_ref):
    # idx_ref:   (1, block_n) int32, lane-dense ids for this tile
    # table_ref: (task_size, emb_p) in VMEM, resident (single-buffered)
    # out_ref:   (block_n, emb_p) output tile
    task_size = table_ref.shape[0]
    block_n = out_ref.shape[0]

    idx = idx_ref[...]                                    # (1, block_n)
    idx = jnp.clip(idx, 0, task_size - 1)                 # guard OOB ids
    iota = jax.lax.broadcasted_iota(jnp.int32, (task_size, block_n), 0)
    onehot_t = (iota == idx).astype(table_ref.dtype)      # (task_size, block_n)

    # out[n, e] = sum_t onehot_t[t, n] * table[t, e]   (contract sublane axis)
    out = jax.lax.dot_general(
        onehot_t,
        table_ref[...],
        dimension_numbers=(((0,), (0,)), ((), ())),
        preferred_element_type=jnp.float32,
    )
    out_ref[...] = out.astype(out_ref.dtype)


def _round_up(x, m):
    return ((x + m - 1) // m) * m


_TARGET_TILE_BYTES = 1 << 20          # ~1 MiB output tile per grid step
_VMEM_SOFT_BUDGET = 40 * (1 << 20)    # headroom under v7x's 64 MiB/TC physical VMEM
_MAX_DENSE_VOCAB = 2048               # beyond this the one-hot matmul stops being cheap


def task_embedding(x, table, *, block_n=None):
    """Equivalent of nn.Embedding(task_size, embedding_size)(x)."""
    orig_shape = x.shape
    idx = x.reshape(-1).astype(jnp.int32)
    n = int(idx.shape[0])
    task_size, emb = table.shape

    # Fallback path: huge vocab (dense one-hot matmul becomes compute/VMEM
    # bound) or integer tables (no int MXU on v7x) -> plain XLA gather.
    if task_size > _MAX_DENSE_VOCAB or not jnp.issubdtype(table.dtype, jnp.floating):
        # TODO(synk): add a scalar-prefetch + row-gather-DMA Pallas path
        # (table left in HBM via memory_space=pl.ANY) for large vocabularies.
        return jnp.take(table, idx, axis=0).reshape(*orig_shape, emb)

    itemsize = jnp.dtype(table.dtype).itemsize
    min_sub = {4: 8, 2: 16, 1: 32}.get(itemsize, 8)

    # Lane-dense output tiles: pad embedding dim to a multiple of 128.
    emb_p = _round_up(emb, 128)
    table_p = table if emb_p == emb else jnp.pad(table, ((0, 0), (0, emb_p - emb)))
    table_bytes = task_size * emb_p * itemsize            # single buffer (Buffered(1))

    def _footprint(bn):
        onehot_bytes = 2 * _round_up(task_size, 8) * bn * 4   # onehot + iota (f32/i32)
        return (table_bytes
                + 2 * bn * emb_p * itemsize                   # output, double-buffered
                + 2 * 8 * bn * 4                              # idx, double-buffered (sublane-padded)
                + onehot_bytes)

    # Tile choice: ~1 MiB output tiles to amortize the ~0.35us/grid-step
    # overhead; multiple of 128 rows (lane-dense idx block + aligned output
    # sublanes); shrunk for tiny n, excess padding waste, or VMEM pressure.
    if block_n is None:
        block_n = _TARGET_TILE_BYTES // (emb_p * itemsize)
    block_n = int(max(128, min(4096, (block_n // 128) * 128)))
    while block_n > 128 and _footprint(block_n) > _VMEM_SOFT_BUDGET:
        block_n //= 2
    if n <= block_n:
        block_n = _round_up(max(n, 1), min_sub)            # single tile, grid=(1,)
    else:
        while block_n > 128 and (_round_up(n, block_n) - n) * 8 > n:
            block_n //= 2                                  # cap pad waste at ~12.5%
    n_padded = _round_up(n, block_n)

    pad = n_padded - n
    if pad:
        idx = jnp.pad(idx, (0, pad))     # padded rows read table row 0, sliced off later
    idx2d = idx.reshape(1, n_padded)

    cost = pl.CostEstimate(
        flops=2 * n_padded * task_size * emb_p,
        transcendentals=0,
        bytes_accessed=idx2d.size * 4 + table_bytes + n_padded * emb_p * itemsize,
    )
    vmem_limit = int(min(max(_footprint(block_n) + (4 << 20), 16 << 20), 64 << 20))

    out = pl.pallas_call(
        _embedding_kernel,
        out_shape=jax.ShapeDtypeStruct((n_padded, emb_p), table.dtype),
        grid_spec=pltpu.PrefetchScalarGridSpec(
            num_scalar_prefetch=0,
            grid=(n_padded // block_n,),
            in_specs=[
                # lane-dense per-tile id row
                pl.BlockSpec((1, block_n), lambda i: (0, i)),
                # whole table resident in VMEM; index_map is constant across
                # the grid so one buffer suffices (halves its VMEM footprint).
                pl.BlockSpec((task_size, emb_p), lambda i: (0, 0),
                             pipeline_mode=pl.Buffered(buffer_count=1)),
            ],
            out_specs=pl.BlockSpec((block_n, emb_p), lambda i: (i, 0)),
        ),
        compiler_params=pltpu.CompilerParams(
            # disjoint output slabs per grid step -> shard across TCs on v7x
            dimension_semantics=("parallel",),
            vmem_limit_bytes=vmem_limit,
        ),
        cost_estimate=cost,
    )(idx2d, table_p)

    if pad:
        out = out[:n]
    if emb_p != emb:
        out = out[:, :emb]
    return out.reshape(*orig_shape, emb)


if __name__ == "__main__":
    key = jax.random.PRNGKey(0)
    k_table, k_idx = jax.random.split(key)

    task_size = 16
    embedding_size = 128  # lane-aligned

    # nn.Embedding default init is N(0, 1); deterministic synthetic weights.
    table = jax.random.normal(k_table, (task_size, embedding_size), jnp.float32)

    # x: integer task ids, e.g. (batch=2, seq=8)
    x = jax.random.randint(k_idx, (2, 8), 0, task_size, dtype=jnp.int32)

    out = task_embedding(x, table)
    out = jax.block_until_ready(out)

    # reference: plain gather
    ref = table[x]
    assert out.shape == (2, 8, embedding_size), out.shape
    assert jnp.allclose(out, ref), "mismatch vs reference gather"

    print("KERNEL_OK")
</pallas_src>

<mosaic_0001>
module attributes {stable_mosaic.version = 11 : i64} {
  func.func @_embedding_kernel(%arg0: i32, %arg1: memref<1x16xi32, #tpu.memory_space<vmem>>, %arg2: memref<16x128xf32, #tpu.memory_space<vmem>>, %arg3: memref<16x128xf32, #tpu.memory_space<vmem>>) attributes {dimension_semantics = [#tpu.dimension_semantics<parallel>], iteration_bounds = array<i64: 1>, scalar_prefetch = 0 : i64, scratch_operands = 0 : i64, tpu.core_type = #tpu.core_type<tc>, window_params = [{transform_indices = @transform_0, window_bounds = array<i64: 1, 16>}, {pipeline_mode = #tpu.pipeline_mode<synchronous>, transform_indices = @transform_1, window_bounds = array<i64: 16, 128>}, {transform_indices = @transform_2, window_bounds = array<i64: 16, 128>}]} {
    %c0 = arith.constant 0 : index
    %c0_0 = arith.constant 0 : index
    %0 = vector.load %arg1[%c0, %c0_0] : memref<1x16xi32, #tpu.memory_space<vmem>>, vector<1x16xi32>
    %c0_i32 = arith.constant 0 : i32
    %c15_i32 = arith.constant 15 : i32
    %1 = vector.broadcast %c0_i32 : i32 to vector<1x16xi32>
    %2 = arith.maxsi %1, %0 : vector<1x16xi32>
    %3 = vector.broadcast %c15_i32 : i32 to vector<1x16xi32>
    %4 = arith.minsi %3, %2 : vector<1x16xi32>
    %5 = tpu.iota {dimensions = array<i32: 0>} : vector<16x16xi32>
    %6 = vector.broadcast %4 : vector<1x16xi32> to vector<16x16xi32>
    %7 = arith.cmpi eq, %5, %6 : vector<16x16xi32>
    %8 = arith.extui %7 : vector<16x16xi1> to vector<16x16xi32>
    %9 = arith.sitofp %8 : vector<16x16xi32> to vector<16x16xf32>
    %c0_1 = arith.constant 0 : index
    %c0_2 = arith.constant 0 : index
    %10 = vector.load %arg2[%c0_1, %c0_2] : memref<16x128xf32, #tpu.memory_space<vmem>>, vector<16x128xf32>
    %cst = arith.constant dense<0.000000e+00> : vector<16x128xf32>
    %11 = tpu.matmul %9, %10, %cst {dimension_numbers = #tpu.dot_dimension_numbers<[0], [0], [1], [1], [0, 1, 1, 1], [], []>} : vector<16x16xf32>, vector<16x128xf32>, vector<16x128xf32> -> vector<16x128xf32>
    %c0_3 = arith.constant 0 : index
    %c0_4 = arith.constant 0 : index
    %12 = vector.load %arg3[%c0_3, %c0_4] : memref<16x128xf32, #tpu.memory_space<vmem>>, vector<16x128xf32>
    tpu.vector_store %arg3[%c0_3, %c0_4], %11 {strides = array<i32>} : memref<16x128xf32, #tpu.memory_space<vmem>>, vector<16x128xf32>,
    return
  }
  func.func @transform_0(%arg0: i32) -> (i32, i32) {
    %c0_i32 = arith.constant 0 : i32
    %c0_i32_0 = arith.constant 0 : i32
    return %c0_i32, %arg0 : i32, i32
  }
  func.func @transform_1(%arg0: i32) -> (i32, i32) {
    %c0_i32 = arith.constant 0 : i32
    %c0_i32_0 = arith.constant 0 : i32
    %c0_i32_1 = arith.constant 0 : i32
    return %c0_i32, %c0_i32_0 : i32, i32
  }
  func.func @transform_2(%arg0: i32) -> (i32, i32) {
    %c0_i32 = arith.constant 0 : i32
    %c0_i32_0 = arith.constant 0 : i32
    return %arg0, %c0_i32 : i32, i32
  }
}

</mosaic_0001>

<bundles_post_ra>
// kernel: tpu_custom_call.1
= control target key start
LH: loop header
LB: loop body
LE: loop exit
PB: predicated region body
PF: predicated region fallthrough
CT: control target
= control target key end

     0   :  { %7 = vsyncpa [#allocation3], 0  ;;  %s315_s0 = inlined_call_operand.hbm [shape: s32[1,16], index: 0, kind: input, shape index: {}]   ;;  %s316_s1 = inlined_call_operand.hbm [shape: f32[16,128], index: 1, kind: input, shape index: {}]   ;;  %s317_s2 = inlined_call_operand.hbm [shape: f32[16,128], index: 2, kind: output, shape index: {}]  }
   0x1   :  { %8 = vsyncpa [#allocation6], 0 }
   0x2   :  { %9 = vsyncpa [#allocation4], 0  ;;  %s279_s9 = smov [#allocation2]   ;;  %s280_s11 = smov [#allocation5]  }
   0x3   :  { %s16_s10 = sshll.u32 %s279_s9, 4  ;;  %s25_s12 = sshll.u32 %s280_s11, 4  ;;  %s17_s10 = int_to_ptr.vmem [resolvable:$true] %s16_s10  ;;  %s26_s12 = int_to_ptr.vmem [resolvable:$true] %s25_s12 }
   0x4   :  { %s221_s13 = scalar_lea.vmem %s17_s10, 16  ;;  %s225_s14 = scalar_lea.vmem %s17_s10, 32 }
   0x5   :  { %p222_p0 = scmp.ne.s32.totalorder %s17_s10, %s221_s13  ;;  %p226_p1 = scmp.lt.s32.totalorder %s17_s10, %s17_s10 }
   0x6   :  { %p227_p2 = scmp.lt.s32.totalorder %s225_s14, %s221_s13 }
   0x8   :  { %p228_p3 = por %p227_p2, %p226_p1 }
   0xa   :  { %p229_p4 = pnand %p228_p3, %p222_p0 }
   0xc   :  { %232 = shalt.err (!%p229_p4)
}
   0xd   :  { %19 = dma.hbm_to_vmem [thread:$0]  %s315_s0, 16, %s17_s10, [#allocation3]  }
   0xe   :  { %s241_s17 = scalar_lea.vmem %s26_s12, 256  ;;  %p246_p6 = scmp.lt.s32.totalorder %s26_s12, %s26_s12 }
   0xf   :  { %p242_p5 = scmp.ne.s32.totalorder %s26_s12, %s241_s17  ;;  %p247_p7 = scmp.lt.s32.totalorder %s241_s17, %s241_s17 }
  0x11   :  { %p248_p8 = por %p247_p7, %p246_p6 }
  0x13   :  { %p249_p9 = pnand %p248_p8, %p242_p5 }
  0x15   :  { %252 = shalt.err (!%p249_p9)
}
  0x16   :  { %s281_s18 = smov 128   ;;  %s282_s19 = smov 8  }
  0x17   :  { %31 = dma.hbm_to_vmem [thread:$0]  %s316_s1, 256, %s26_s12, [#allocation6], %s281_s18, %s281_s18, %s282_s19  }
  0x18   :  { %273 = dma.done.wait [#allocation3], 16  }
  0x19   :  { %274 = vsyncadd [#allocation3], 4294967280 }
  0x1a   :  { %275 = dma.done.wait [#allocation6], 256  }
  0x1b   :  { %276 = vsyncadd [#allocation6], 4294967040  ;;  %v43_v0 = vlaneseq  ;;  %v38_v2 = vld [vmem:[#allocation2] sm:$0x1]  ;;  %v57_v8 = vld [vmem:[#allocation5 + $0x8] sm:$0xff]  ;;  %v283_v10 = vmov 0.0  }
  0x1c   :  { %vm39_vm0 = vcmp.gt.s32.totalorder %v38_v2, 0  ;;  %200 = vmatprep.subr.mxu0 %v57_v8  ;;  %v56_v9 = vld [vmem:[#allocation5] sm:$0xff]  ;;  %vm90_vm4 = vcmask 130048   ;;  %s284_s0 = smov [#allocation7]  }
  0x1d   :  { %v44_v1 = vshrl.u32 %v43_v0, 7  ;;  %v40_v4 = vsel %vm39_vm0, %v38_v2, 0  ;;  %201 = vmatpush3.msra.mxu0 %v57_v8  ;;  %s179_s1 = sshll.u32 %s284_s0, 4  ;;  %s180_s1 = int_to_ptr.vmem [resolvable:$true] %s179_s1 }
  0x1e   :  { %vm41_vm1 = vcmp.lt.s32.totalorder %v40_v4, 15  ;;  %202 = vmatprep.subr.mxu0 %v56_v9  ;;  %s253_s22 = scalar_lea.vmem %s180_s1, 256  ;;  %p258_p11 = scmp.lt.s32.totalorder %s180_s1, %s180_s1 }
  0x1f   :  { %v48_v3 = vsub.s32 0, %v44_v1  ;;  %v45_v5 = vadd.s32 8, %v44_v1  ;;  %v42_v6 = vsel %vm41_vm1, %v40_v4, 15  ;;  %203 = vmatpush3.msra.mxu0 %v56_v9  ;;  %p254_p10 = scmp.ne.s32.totalorder %s180_s1, %s253_s22  ;;  %p259_p12 = scmp.lt.s32.totalorder %s253_s22, %s253_s22 }
  0x21   :  { %v49_v7 = vrot.slane %v42_v6, %v48_v3  ;;  %p260_p13 = por %p259_p12, %p258_p11 }
  0x23   :  { %vm50_vm2 = vcmp.eq.s32.totalorder %v44_v1, %v49_v7  ;;  %vm51_vm3 = vcmp.eq.s32.totalorder %v45_v5, %v49_v7  ;;  %p261_p0 = pnand %p260_p13, %p254_p10 }
  0x24   :  { %v192_v11 = vsel %vm50_vm2, 1.0, %v283_v10  ;;  %v193_v12 = vsel %vm51_vm3, 1.0, %v283_v10 }
  0x25   :  { %58 = vxpose.xlu0.b32.start [1/2] (short) (narrow) %v192_v11, 16 }
  0x29   :  { %59 = vxpose.xlu0.b32.end [2/2] (short) (narrow) %v193_v12, 16 }
  0xa1   :  { %v74_v13 = vpop.trf.xlu0 }
  0xa2   :  { %204 = vmatprep.mubr.msk.f32.mxu0 %vm90_vm4, %v74_v13 }
  0xa5   :  { %v75_v14 = vpop.trf.xlu0 }
  0xa6   :  { %205 = vmatmul.mubr.msk.f32.vlgmr.msra.gmra.mxu0 %vm90_vm4, %v75_v14 }
 0x166   :  { %v206_v15 = vpop.f32.mrf.mxu0 }
 0x167   :  { %173 = vst [vmem:[#allocation7 + $0x8] sm:$0xff] %v206_v15 }
 0x168   :  { %v163_v16 = vpop.f32.mrf.mxu0 }
 0x169   :  { %172 = vst [vmem:[#allocation7] sm:$0xff] %v163_v16 }
 0x16a   :  { %264 = shalt.err (!%p261_p0)
}
 0x16b   :  { %185 = dma.vmem_to_hbm [thread:$0]  %s180_s1, 256, %s317_s2, [#allocation4], %s281_s18, %s281_s18, %s282_s19  }
 0x16c   :  { %277 = dma.done.wait [#allocation4], 256  }
 0x16d   :  { %278 = vsyncadd [#allocation4], 4294967040 }
 0x16e   :  { %189 = vsyncpa [#allocation3], 1 }
 0x16f   :  { %190 = vsyncpa [#allocation6], 1 }
 0x170   :  { %191 = vsyncpa [#allocation4], 1 }

</bundles_post_ra>
